<compile_context>
chip_gen: v7x
topology: tpu7x:2x2x1
jax: 0.10.0
libtpu: 0.0.40
codegen_flags: <defaults>
</compile_context>

<pallas_src>
import functools

import jax
import jax.numpy as jnp
from jax.experimental import pallas as pl
from jax.experimental.pallas import tpu as pltpu


def _round_up(x, m):
    return (x + m - 1) // m * m


# --------------------------------------------------------------------------------------
# Stage 1: per-edge message precompute   msg = (rbf @ W_rbf) * m      (1-D grid over edges)
# --------------------------------------------------------------------------------------
def _message_kernel(rbf_ref, m_ref, w_rbf_ref, msg_ref):
    # [E_TILE, R_pad] @ [R_pad, F_pad] -> f32, then bf16 multiply with m (bf16 VALU on v6e/v7x).
    e = jnp.dot(rbf_ref[...], w_rbf_ref[...], preferred_element_type=jnp.float32)
    msg_ref[...] = e.astype(jnp.bfloat16) * m_ref[...]


# --------------------------------------------------------------------------------------
# Stage 2: scatter-add (sorted edges, one-hot MXU contraction) + dense chain + out proj
# --------------------------------------------------------------------------------------
def _scatter_mlp_kernel(num_lin,
                        atile_ref, etile_ref, valid_ref,       # SMEM scalar-prefetch work lists
                        dst_ref,                               # [1, E_TILE] int32 (sorted dst)
                        msg_ref,                               # [E_TILE, F_pad] bf16
                        w_dense_ref,                           # [L, F_pad, F_pad] bf16 (resident)
                        b_dense_ref,                           # [L, 1, F_pad]  f32  (resident)
                        w_out_ref,                             # [F_pad, O_pad] bf16 (resident)
                        out_ref,                               # [N_TILE, O_pad] f32
                        acc_ref):                              # [N_TILE, F_pad] f32 scratch
    w = pl.program_id(0)
    nw = pl.num_programs(0)
    at = atile_ref[w]
    n_tile = acc_ref.shape[0]

    # Work items are grouped by atom tile (non-decreasing atile); detect run boundaries.
    is_first = jnp.logical_or(w == 0, at != atile_ref[jnp.maximum(w - 1, 0)])
    is_last = jnp.logical_or(w == nw - 1, at != atile_ref[jnp.minimum(w + 1, nw - 1)])

    @pl.when(is_first)
    def _init():
        acc_ref[...] = jnp.zeros_like(acc_ref)

    @pl.when(valid_ref[w] != 0)
    def _accumulate():
        # One-hot scatter matrix built on the VPU: S[i, j] = (dst[j] - at*N_TILE == i).
        # Sorted-out-of-range dsts and the sentinel (>= N_pad) never match -> contribute zero.
        shifted = dst_ref[...] - at * n_tile                                  # [1, E_TILE]
        row_ids = jax.lax.broadcasted_iota(jnp.int32, (n_tile, dst_ref.shape[1]), 0)
        onehot = (shifted == row_ids).astype(jnp.bfloat16)                    # [N_TILE, E_TILE]
        # scatter_add as MXU contraction: [N_TILE, E_TILE] @ [E_TILE, F_pad] (f32 accumulate)
        acc_ref[...] += jnp.dot(onehot, msg_ref[...], preferred_element_type=jnp.float32)

    @pl.when(is_last)
    def _finalize():
        atom = acc_ref[...]
        for i in range(num_lin):
            h = jnp.dot(atom.astype(jnp.bfloat16), w_dense_ref[i],
                        preferred_element_type=jnp.float32) + b_dense_ref[i]
            atom = h * jax.nn.sigmoid(h)                                      # swish / SiLU (EUP)
        out_ref[...] = jnp.dot(atom.astype(jnp.bfloat16), w_out_ref[...],
                               preferred_element_type=jnp.float32)


def _vmem_limit_bytes(need_bytes):
    cap = 128 * 1024 * 1024
    try:
        cap = int(pltpu.get_tpu_info().vmem_capacity_bytes)
    except Exception:
        pass
    # 2x the tile requirement + 8 MiB slack, floor 32 MiB, never more than 75% of physical VMEM
    # (leaves compiler-scratch headroom on v7x's 64 MiB per-core VMEM).
    return int(min(max(2 * need_bytes + (8 << 20), 32 << 20), int(cap * 0.75)))


@functools.partial(jax.jit, static_argnames=("num_atoms", "num_lin", "n_tile", "e_tile"))
def output_layer_forward(m_ji, rbf_ji, atom_edge_index, params, *,
                         num_atoms, num_lin, n_tile=512, e_tile=1024):
    """Pallas-backed OutputLayer.forward.

    m_ji:            [E, F]   edge messages
    rbf_ji:          [E, R]   radial basis features
    atom_edge_index: [2, E]   int32, row 1 = destination atom index
    """
    E, F = m_ji.shape
    R = rbf_ji.shape[1]
    O = params["w_out"].shape[1]
    N = num_atoms
    L = max(num_lin, 1)

    # Lane-pad feature-like dims to 128; row tiles to multiples of 8 / 128.
    F_pad = _round_up(F, 128)
    R_pad = _round_up(R, 128)
    O_pad = _round_up(O, 128)
    N_TILE = min(n_tile, _round_up(N, 8))
    N_pad = _round_up(N, N_TILE)
    E_TILE = min(e_tile, _round_up(E, 128))
    E_pad = _round_up(E, E_TILE)
    n_tiles = N_pad // N_TILE
    e_tiles = E_pad // E_TILE

    # ---- sort edges by destination atom; gather + edge padding fused into one take ----
    dst = atom_edge_index[1, :].astype(jnp.int32)
    order = jnp.argsort(dst)
    if E_pad > E:
        pad_idx = jnp.concatenate([order, jnp.full((E_pad - E,), E, order.dtype)])
    else:
        pad_idx = order
    m_sp = jnp.take(m_ji.astype(jnp.bfloat16), pad_idx, axis=0, mode="fill", fill_value=0)
    rbf_sp = jnp.take(rbf_ji.astype(jnp.bfloat16), pad_idx, axis=0, mode="fill", fill_value=0)
    if F_pad > F:
        m_sp = jnp.pad(m_sp, ((0, 0), (0, F_pad - F)))
    if R_pad > R:
        rbf_sp = jnp.pad(rbf_sp, ((0, 0), (0, R_pad - R)))
    # Sentinel N_pad: sorts after every real atom index and never matches any one-hot row.
    dst_sorted = jnp.take(dst, pad_idx, axis=0, mode="fill", fill_value=N_pad)
    dst_p = dst_sorted[None, :]                                               # [1, E_pad]

    # ---- pad + cast weights (zeros in padding keep padded lanes exactly zero end-to-end) ----
    w_rbf_p = jnp.zeros((R_pad, F_pad), jnp.bfloat16).at[:R, :F].set(
        params["w_rbf"].astype(jnp.bfloat16))
    w_dense_p = jnp.zeros((L, F_pad, F_pad), jnp.bfloat16)
    b_dense_p = jnp.zeros((L, 1, F_pad), jnp.float32)
    if num_lin > 0:
        w_dense_p = w_dense_p.at[:num_lin, :F, :F].set(params["w_dense"].astype(jnp.bfloat16))
        b_dense_p = b_dense_p.at[:num_lin, :, :F].set(params["b_dense"].astype(jnp.float32))
    w_out_p = jnp.zeros((F_pad, O_pad), jnp.bfloat16).at[:F, :O].set(
        params["w_out"].astype(jnp.bfloat16))

    # ---- Stage 1: per-edge messages (hoisted out of the scatter grid) ----
    msg_p = pl.pallas_call(
        _message_kernel,
        out_shape=jax.ShapeDtypeStruct((E_pad, F_pad), jnp.bfloat16),
        grid_spec=pltpu.PrefetchScalarGridSpec(
            num_scalar_prefetch=0,
            grid=(e_tiles,),
            in_specs=[
                pl.BlockSpec((E_TILE, R_pad), lambda e: (e, 0)),
                pl.BlockSpec((E_TILE, F_pad), lambda e: (e, 0)),
                pl.BlockSpec((R_pad, F_pad), lambda e: (0, 0)),               # resident
            ],
            out_specs=pl.BlockSpec((E_TILE, F_pad), lambda e: (e, 0)),
        ),
        compiler_params=pltpu.CompilerParams(dimension_semantics=("parallel",)),
        cost_estimate=pl.CostEstimate(
            flops=int(2 * E_pad * R_pad * F_pad + E_pad * F_pad),
            transcendentals=0,
            bytes_accessed=int(E_pad * (R_pad + 2 * F_pad) * 2 + R_pad * F_pad * 2)),
    )(rbf_sp, m_sp, w_rbf_p)

    # ---- Build scalar-prefetch work lists: (atom_tile, edge_tile, valid) per work item ----
    # Per atom tile n, edges with dst in [n*N_TILE, (n+1)*N_TILE) occupy a contiguous sorted range.
    bounds = jnp.arange(n_tiles + 1, dtype=jnp.int32) * N_TILE
    first_edge = jnp.searchsorted(dst_sorted, bounds, side="left").astype(jnp.int32)
    lo, hi = first_edge[:-1], first_edge[1:]
    start_t = lo // E_TILE
    end_t = (hi + E_TILE - 1) // E_TILE
    span = jnp.where(hi > lo, end_t - start_t, 0).astype(jnp.int32)           # edge tiles needed
    count = jnp.maximum(span, 1)                                              # >=1 item per tile
    offsets = jnp.concatenate(
        [jnp.zeros((1,), jnp.int32), jnp.cumsum(count, dtype=jnp.int32)])
    total = offsets[-1]

    # Static worst-case number of work items: every edge tile once + one straddle per atom tile.
    W = e_tiles + n_tiles
    wids = jnp.arange(W, dtype=jnp.int32)
    n_of_w = jnp.clip(jnp.searchsorted(offsets, wids, side="right") - 1,
                      0, n_tiles - 1).astype(jnp.int32)
    j_of_w = wids - offsets[n_of_w]
    valid = ((wids < total) & (j_of_w < span[n_of_w])).astype(jnp.int32)
    # Padding / empty items stay on the last needed edge tile so no extra DMA is triggered.
    etile = jnp.clip(start_t[n_of_w] + jnp.clip(j_of_w, 0, count[n_of_w] - 1),
                     0, e_tiles - 1).astype(jnp.int32)
    atile = n_of_w

    # ---- Stage 2: scatter + MLP ----
    kernel = functools.partial(_scatter_mlp_kernel, num_lin)

    flops = int(2 * W * N_TILE * E_TILE * F_pad
                + num_lin * 2 * N_pad * F_pad * F_pad
                + 2 * N_pad * F_pad * O_pad)
    transcendentals = int(num_lin * N_pad * F_pad)
    bytes_accessed = int(W * (E_TILE * F_pad * 2 + E_TILE * 4)
                         + L * F_pad * F_pad * 2 + L * F_pad * 4 + F_pad * O_pad * 2
                         + N_pad * O_pad * 4)

    vmem_need = (2 * (E_TILE * F_pad * 2 + E_TILE * 4)      # msg + dst, double-buffered
                 + 2 * N_TILE * O_pad * 4                   # out block, double-buffered
                 + N_TILE * F_pad * 4                       # f32 accumulator scratch
                 + N_TILE * E_TILE * 2                      # one-hot intermediate
                 + L * F_pad * F_pad * 2 + L * F_pad * 4 + F_pad * O_pad * 2)

    out_padded = pl.pallas_call(
        kernel,
        out_shape=jax.ShapeDtypeStruct((N_pad, O_pad), jnp.float32),
        grid_spec=pltpu.PrefetchScalarGridSpec(
            num_scalar_prefetch=3,
            grid=(W,),
            in_specs=[
                pl.BlockSpec((1, E_TILE), lambda w, at, et, vl: (0, et[w])),            # dst
                pl.BlockSpec((E_TILE, F_pad), lambda w, at, et, vl: (et[w], 0)),        # msg
                pl.BlockSpec((L, F_pad, F_pad), lambda w, at, et, vl: (0, 0, 0)),       # w_dense
                pl.BlockSpec((L, 1, F_pad), lambda w, at, et, vl: (0, 0, 0)),           # b_dense
                pl.BlockSpec((F_pad, O_pad), lambda w, at, et, vl: (0, 0)),             # w_out
            ],
            out_specs=pl.BlockSpec((N_TILE, O_pad), lambda w, at, et, vl: (at[w], 0)),
            scratch_shapes=[pltpu.VMEM((N_TILE, F_pad), jnp.float32)],
        ),
        compiler_params=pltpu.CompilerParams(
            # The work list accumulates into a data-dependent output block -> sequential grid.
            dimension_semantics=("arbitrary",),
            vmem_limit_bytes=_vmem_limit_bytes(vmem_need),
        ),
        cost_estimate=pl.CostEstimate(flops=flops,
                                      transcendentals=transcendentals,
                                      bytes_accessed=bytes_accessed),
    )(atile, etile, valid, dst_p, msg_p, w_dense_p, b_dense_p, w_out_p)

    # Padded atom rows / output lanes are discarded here (finalize work on them is harmless).
    return out_padded[:N, :O]


def init_params(key, feature_dim, dim_rbf, n_output, num_lin):
    k1, k2, k3 = jax.random.split(key, 3)
    w_rbf = jax.random.normal(k1, (dim_rbf, feature_dim), jnp.float32) * 0.1
    w_dense = jax.random.normal(k2, (num_lin, feature_dim, feature_dim), jnp.float32) * 0.1
    b_dense = jax.random.normal(k3, (num_lin, 1, feature_dim), jnp.float32) * 0.1
    # out_lin.weight.data.zero_() in the reference module:
    w_out = jnp.zeros((feature_dim, n_output), jnp.float32)
    return {"w_rbf": w_rbf, "w_dense": w_dense, "b_dense": b_dense, "w_out": w_out}


def reference_forward(m_ji, rbf_ji, atom_edge_index, params, *, num_atoms, num_lin,
                      mxu_dtype=None):
    """Pure-JAX reference. If mxu_dtype is set, matmul/multiply operands mimic the kernel."""
    if mxu_dtype is not None:
        cast = lambda x: x.astype(mxu_dtype)
        e = jnp.dot(cast(rbf_ji), cast(params["w_rbf"]), preferred_element_type=jnp.float32)
        msg = (e.astype(mxu_dtype) * cast(m_ji)).astype(jnp.float32)
    else:
        cast = lambda x: x
        e = jnp.dot(rbf_ji, params["w_rbf"])
        msg = e * m_ji
    atom = jnp.zeros((num_atoms, m_ji.shape[1]), jnp.float32).at[atom_edge_index[1, :]].add(msg)
    for i in range(num_lin):
        h = jnp.dot(cast(atom), cast(params["w_dense"][i]),
                    preferred_element_type=jnp.float32) + params["b_dense"][i]
        atom = h * jax.nn.sigmoid(h)
    return jnp.dot(cast(atom), cast(params["w_out"]), preferred_element_type=jnp.float32)


if __name__ == "__main__":
    def run_case(name, E, N, F, R, O, num_lin, n_tile, e_tile, seed, dst_max=None):
        key = jax.random.PRNGKey(seed)
        k_m, k_rbf, k_idx, k_p, k_w = jax.random.split(key, 5)

        m_ji = jax.random.normal(k_m, (E, F), jnp.float32)
        rbf_ji = jax.random.normal(k_rbf, (E, R), jnp.float32)
        hi_dst = N if dst_max is None else dst_max
        dst = jax.random.randint(k_idx, (E,), 0, hi_dst, jnp.int32)
        src = jax.random.randint(jax.random.fold_in(k_idx, 1), (E,), 0, N, jnp.int32)
        atom_edge_index = jnp.stack([src, dst], axis=0)

        params = init_params(k_p, F, R, O, num_lin)

        # 1) Module default: out_lin is zero-initialized => forward output is exactly zero.
        out0 = jax.block_until_ready(output_layer_forward(
            m_ji, rbf_ji, atom_edge_index, params,
            num_atoms=N, num_lin=num_lin, n_tile=n_tile, e_tile=e_tile))
        assert out0.shape == (N, O)
        assert jnp.all(out0 == 0.0), f"{name}: zero-init out_lin must give an all-zero output"

        # 2) Non-trivial out_lin (as after training) => check against pure-JAX references.
        params = dict(params, w_out=jax.random.normal(k_w, (F, O), jnp.float32) * 0.1)
        out = jax.block_until_ready(output_layer_forward(
            m_ji, rbf_ji, atom_edge_index, params,
            num_atoms=N, num_lin=num_lin, n_tile=n_tile, e_tile=e_tile))

        # Check vs a reference that uses the same bf16 MXU operands as the kernel.
        ref_bf16 = reference_forward(m_ji, rbf_ji, atom_edge_index, params,
                                     num_atoms=N, num_lin=num_lin, mxu_dtype=jnp.bfloat16)
        assert jnp.allclose(out, ref_bf16, atol=2e-3, rtol=2e-3), \
            f"{name}: mismatch vs bf16-matched reference"

        # Looser check vs the full-f32 reference (bf16 MXU operands are a deliberate tradeoff).
        ref_f32 = reference_forward(m_ji, rbf_ji, atom_edge_index, params,
                                    num_atoms=N, num_lin=num_lin, mxu_dtype=None)
        assert jnp.allclose(out, ref_f32, atol=5e-2, rtol=5e-2), \
            f"{name}: mismatch vs f32 reference"

    # Small shapes consistent with the module.
    run_case("small", E=16, N=8, F=32, R=16, O=4, num_lin=2,
             n_tile=512, e_tile=1024, seed=0)
    # Multi-tile case: several atom tiles and edge tiles, boundary straddles, and atom tiles
    # with no incoming edges (dst restricted to [0, 24) while N=50) — exercises the sorted
    # work-list, tile-skip and empty-tile paths.
    run_case("multi_tile", E=300, N=50, F=64, R=8, O=3, num_lin=3,
             n_tile=16, e_tile=128, seed=1, dst_max=24)

    print("KERNEL_OK")
</pallas_src>

<mosaic_0001>
module attributes {stable_mosaic.version = 11 : i64} {
  func.func @_message_kernel(%arg0: i32, %arg1: memref<128x128xbf16, #tpu.memory_space<vmem>>, %arg2: memref<128x128xbf16, #tpu.memory_space<vmem>>, %arg3: memref<128x128xbf16, #tpu.memory_space<vmem>>, %arg4: memref<128x128xbf16, #tpu.memory_space<vmem>>) attributes {dimension_semantics = [#tpu.dimension_semantics<parallel>], iteration_bounds = array<i64: 1>, scalar_prefetch = 0 : i64, scratch_operands = 0 : i64, tpu.core_type = #tpu.core_type<tc>, window_params = [{transform_indices = @transform_0, window_bounds = array<i64: 128, 128>}, {transform_indices = @transform_1, window_bounds = array<i64: 128, 128>}, {pipeline_mode = #tpu.pipeline_mode<synchronous>, transform_indices = @transform_2, window_bounds = array<i64: 128, 128>}, {transform_indices = @transform_3, window_bounds = array<i64: 128, 128>}]} {
    %c0 = arith.constant 0 : index
    %c0_0 = arith.constant 0 : index
    %0 = vector.load %arg1[%c0, %c0_0] : memref<128x128xbf16, #tpu.memory_space<vmem>>, vector<128x128xbf16>
    %c0_1 = arith.constant 0 : index
    %c0_2 = arith.constant 0 : index
    %1 = vector.load %arg3[%c0_1, %c0_2] : memref<128x128xbf16, #tpu.memory_space<vmem>>, vector<128x128xbf16>
    %cst = arith.constant dense<0.000000e+00> : vector<128x128xf32>
    %2 = tpu.matmul %0, %1, %cst {dimension_numbers = #tpu.dot_dimension_numbers<[1], [0], [0], [1], [0, 0, 1, 1], [], []>} : vector<128x128xbf16>, vector<128x128xbf16>, vector<128x128xf32> -> vector<128x128xf32>
    %3 = arith.truncf %2 : vector<128x128xf32> to vector<128x128xbf16>
    %c0_3 = arith.constant 0 : index
    %c0_4 = arith.constant 0 : index
    %4 = vector.load %arg2[%c0_3, %c0_4] : memref<128x128xbf16, #tpu.memory_space<vmem>>, vector<128x128xbf16>
    %5 = arith.mulf %3, %4 : vector<128x128xbf16>
    %c0_5 = arith.constant 0 : index
    %c0_6 = arith.constant 0 : index
    %6 = vector.load %arg4[%c0_5, %c0_6] : memref<128x128xbf16, #tpu.memory_space<vmem>>, vector<128x128xbf16>
    tpu.vector_store %arg4[%c0_5, %c0_6], %5 {strides = array<i32>} : memref<128x128xbf16, #tpu.memory_space<vmem>>, vector<128x128xbf16>,
    return
  }
  func.func @transform_0(%arg0: i32) -> (i32, i32) {
    %c0_i32 = arith.constant 0 : i32
    %c0_i32_0 = arith.constant 0 : i32
    return %arg0, %c0_i32 : i32, i32
  }
  func.func @transform_1(%arg0: i32) -> (i32, i32) {
    %c0_i32 = arith.constant 0 : i32
    %c0_i32_0 = arith.constant 0 : i32
    return %arg0, %c0_i32 : i32, i32
  }
  func.func @transform_2(%arg0: i32) -> (i32, i32) {
    %c0_i32 = arith.constant 0 : i32
    %c0_i32_0 = arith.constant 0 : i32
    %c0_i32_1 = arith.constant 0 : i32
    return %c0_i32, %c0_i32_0 : i32, i32
  }
  func.func @transform_3(%arg0: i32) -> (i32, i32) {
    %c0_i32 = arith.constant 0 : i32
    %c0_i32_0 = arith.constant 0 : i32
    return %arg0, %c0_i32 : i32, i32
  }
}

module attributes {stable_mosaic.version = 11 : i64} {
  func.func @_scatter_mlp_kernel(%arg0: i32, %arg1: memref<2xi32, #tpu.memory_space<smem>>, %arg2: memref<2xi32, #tpu.memory_space<smem>>, %arg3: memref<2xi32, #tpu.memory_space<smem>>, %arg4: memref<1x128xi32, #tpu.memory_space<vmem>>, %arg5: memref<128x128xbf16, #tpu.memory_space<vmem>>, %arg6: memref<2x128x128xbf16, #tpu.memory_space<vmem>>, %arg7: memref<2x1x128xf32, #tpu.memory_space<vmem>>, %arg8: memref<128x128xbf16, #tpu.memory_space<vmem>>, %arg9: memref<8x128xf32, #tpu.memory_space<vmem>>, %arg10: memref<8x128xf32, #tpu.memory_space<vmem>>) attributes {dimension_semantics = [#tpu.dimension_semantics<arbitrary>], iteration_bounds = array<i64: 2>, scalar_prefetch = 3 : i64, scratch_operands = 1 : i64, tpu.core_type = #tpu.core_type<tc>, window_params = [{transform_indices = @transform_0, window_bounds = array<i64: 1, 128>}, {transform_indices = @transform_1, window_bounds = array<i64: 128, 128>}, {pipeline_mode = #tpu.pipeline_mode<synchronous>, transform_indices = @transform_2, window_bounds = array<i64: 2, 128, 128>}, {pipeline_mode = #tpu.pipeline_mode<synchronous>, transform_indices = @transform_3, window_bounds = array<i64: 2, 1, 128>}, {pipeline_mode = #tpu.pipeline_mode<synchronous>, transform_indices = @transform_4, window_bounds = array<i64: 128, 128>}, {transform_indices = @transform_5, window_bounds = array<i64: 8, 128>}]} {
    %0 = arith.index_cast %arg0 : i32 to index
    %1 = memref.load %arg1[%0] : memref<2xi32, #tpu.memory_space<smem>>
    %c0_i32 = arith.constant 0 : i32
    %2 = arith.cmpi eq, %arg0, %c0_i32 : i32
    %c1_i32 = arith.constant 1 : i32
    %3 = arith.subi %arg0, %c1_i32 : i32
    %c0_i32_0 = arith.constant 0 : i32
    %4 = arith.maxsi %3, %c0_i32_0 : i32
    %5 = arith.index_cast %4 : i32 to index
    %6 = memref.load %arg1[%5] : memref<2xi32, #tpu.memory_space<smem>>
    %7 = arith.cmpi ne, %1, %6 : i32
    %8 = arith.ori %2, %7 : i1
    %c1_i32_1 = arith.constant 1 : i32
    %9 = arith.cmpi eq, %arg0, %c1_i32_1 : i32
    %c1_i32_2 = arith.constant 1 : i32
    %10 = arith.addi %arg0, %c1_i32_2 : i32
    %c1_i32_3 = arith.constant 1 : i32
    %11 = arith.minsi %10, %c1_i32_3 : i32
    %12 = arith.index_cast %11 : i32 to index
    %13 = memref.load %arg1[%12] : memref<2xi32, #tpu.memory_space<smem>>
    %14 = arith.cmpi ne, %1, %13 : i32
    %15 = arith.ori %9, %14 : i1
    %16 = arith.extui %8 : i1 to i32
    %c0_i32_4 = arith.constant 0 : i32
    %17 = arith.cmpi ne, %16, %c0_i32_4 : i32
    scf.if %17 {
      %cst = arith.constant 0.000000e+00 : f32
      %25 = vector.broadcast %cst : f32 to vector<8x128xf32>
      %c0 = arith.constant 0 : index
      %c0_8 = arith.constant 0 : index
      %26 = vector.load %arg10[%c0, %c0_8] : memref<8x128xf32, #tpu.memory_space<vmem>>, vector<8x128xf32>
      tpu.vector_store %arg10[%c0, %c0_8], %25 {strides = array<i32>} : memref<8x128xf32, #tpu.memory_space<vmem>>, vector<8x128xf32>,
    } else {
    }
    %18 = arith.index_cast %arg0 : i32 to index
    %19 = memref.load %arg3[%18] : memref<2xi32, #tpu.memory_space<smem>>
    %c0_i32_5 = arith.constant 0 : i32
    %20 = arith.cmpi ne, %19, %c0_i32_5 : i32
    %21 = arith.extui %20 : i1 to i32
    %c0_i32_6 = arith.constant 0 : i32
    %22 = arith.cmpi ne, %21, %c0_i32_6 : i32
    scf.if %22 {
      %c0 = arith.constant 0 : index
      %c0_8 = arith.constant 0 : index
      %25 = vector.load %arg4[%c0, %c0_8] : memref<1x128xi32, #tpu.memory_space<vmem>>, vector<1x128xi32>
      %c8_i32 = arith.constant 8 : i32
      %26 = arith.muli %1, %c8_i32 : i32
      %27 = vector.broadcast %26 : i32 to vector<1x128xi32>
      %28 = arith.subi %25, %27 : vector<1x128xi32>
      %29 = tpu.iota {dimensions = array<i32: 0>} : vector<8x128xi32>
      %30 = vector.broadcast %28 : vector<1x128xi32> to vector<8x128xi32>
      %31 = arith.cmpi eq, %30, %29 : vector<8x128xi32>
      %32 = arith.extui %31 : vector<8x128xi1> to vector<8x128xi32>
      %33 = arith.sitofp %32 : vector<8x128xi32> to vector<8x128xf32>
      %34 = arith.truncf %33 : vector<8x128xf32> to vector<8x128xbf16>
      %c0_9 = arith.constant 0 : index
      %c0_10 = arith.constant 0 : index
      %35 = vector.load %arg10[%c0_9, %c0_10] : memref<8x128xf32, #tpu.memory_space<vmem>>, vector<8x128xf32>
      %c0_11 = arith.constant 0 : index
      %c0_12 = arith.constant 0 : index
      %36 = vector.load %arg5[%c0_11, %c0_12] : memref<128x128xbf16, #tpu.memory_space<vmem>>, vector<128x128xbf16>
      %cst = arith.constant dense<0.000000e+00> : vector<8x128xf32>
      %37 = tpu.matmul %34, %36, %cst {dimension_numbers = #tpu.dot_dimension_numbers<[1], [0], [0], [1], [0, 0, 1, 1], [], []>} : vector<8x128xbf16>, vector<128x128xbf16>, vector<8x128xf32> -> vector<8x128xf32>
      %38 = arith.addf %35, %37 : vector<8x128xf32>
      %c0_13 = arith.constant 0 : index
      %c0_14 = arith.constant 0 : index
      %39 = vector.load %arg10[%c0_13, %c0_14] : memref<8x128xf32, #tpu.memory_space<vmem>>, vector<8x128xf32>
      tpu.vector_store %arg10[%c0_13, %c0_14], %38 {strides = array<i32>} : memref<8x128xf32, #tpu.memory_space<vmem>>, vector<8x128xf32>,
    } else {
    }
    %23 = arith.extui %15 : i1 to i32
    %c0_i32_7 = arith.constant 0 : i32
    %24 = arith.cmpi ne, %23, %c0_i32_7 : i32
    scf.if %24 {
      %c0 = arith.constant 0 : index
      %c0_8 = arith.constant 0 : index
      %25 = vector.load %arg10[%c0, %c0_8] : memref<8x128xf32, #tpu.memory_space<vmem>>, vector<8x128xf32>
      %26 = arith.truncf %25 : vector<8x128xf32> to vector<8x128xbf16>
      %c0_9 = arith.constant 0 : index
      %c0_10 = arith.constant 0 : index
      %c0_11 = arith.constant 0 : index
      %27 = vector.load %arg6[%c0_9, %c0_10, %c0_11] : memref<2x128x128xbf16, #tpu.memory_space<vmem>>, vector<1x128x128xbf16>
      %28 = vector.shape_cast %27 : vector<1x128x128xbf16> to vector<128x128xbf16>
      %cst = arith.constant dense<0.000000e+00> : vector<8x128xf32>
      %29 = tpu.matmul %26, %28, %cst {dimension_numbers = #tpu.dot_dimension_numbers<[1], [0], [0], [1], [0, 0, 1, 1], [], []>} : vector<8x128xbf16>, vector<128x128xbf16>, vector<8x128xf32> -> vector<8x128xf32>
      %c0_12 = arith.constant 0 : index
      %c0_13 = arith.constant 0 : index
      %c0_14 = arith.constant 0 : index
      %30 = vector.load %arg7[%c0_12, %c0_13, %c0_14] : memref<2x1x128xf32, #tpu.memory_space<vmem>>, vector<1x1x128xf32>
      %31 = vector.shape_cast %30 : vector<1x1x128xf32> to vector<1x128xf32>
      %32 = vector.broadcast %31 : vector<1x128xf32> to vector<8x128xf32>
      %33 = arith.addf %29, %32 : vector<8x128xf32>
      %34 = arith.negf %33 : vector<8x128xf32>
      %35 = math.exp %34 : vector<8x128xf32>
      %cst_15 = arith.constant 1.000000e+00 : f32
      %36 = vector.broadcast %cst_15 : f32 to vector<8x128xf32>
      %37 = arith.addf %36, %35 : vector<8x128xf32>
      %38 = arith.divf %36, %37 : vector<8x128xf32>
      %39 = arith.mulf %33, %38 : vector<8x128xf32>
      %40 = arith.truncf %39 : vector<8x128xf32> to vector<8x128xbf16>
      %c1 = arith.constant 1 : index
      %c0_16 = arith.constant 0 : index
      %c0_17 = arith.constant 0 : index
      %41 = vector.load %arg6[%c1, %c0_16, %c0_17] : memref<2x128x128xbf16, #tpu.memory_space<vmem>>, vector<1x128x128xbf16>
      %42 = vector.shape_cast %41 : vector<1x128x128xbf16> to vector<128x128xbf16>
      %cst_18 = arith.constant dense<0.000000e+00> : vector<8x128xf32>
      %43 = tpu.matmul %40, %42, %cst_18 {dimension_numbers = #tpu.dot_dimension_numbers<[1], [0], [0], [1], [0, 0, 1, 1], [], []>} : vector<8x128xbf16>, vector<128x128xbf16>, vector<8x128xf32> -> vector<8x128xf32>
      %c1_19 = arith.constant 1 : index
      %c0_20 = arith.constant 0 : index
      %c0_21 = arith.constant 0 : index
      %44 = vector.load %arg7[%c1_19, %c0_20, %c0_21] : memref<2x1x128xf32, #tpu.memory_space<vmem>>, vector<1x1x128xf32>
      %45 = vector.shape_cast %44 : vector<1x1x128xf32> to vector<1x128xf32>
      %46 = vector.broadcast %45 : vector<1x128xf32> to vector<8x128xf32>
      %47 = arith.addf %43, %46 : vector<8x128xf32>
      %48 = arith.negf %47 : vector<8x128xf32>
      %49 = math.exp %48 : vector<8x128xf32>
      %cst_22 = arith.constant 1.000000e+00 : f32
      %50 = vector.broadcast %cst_22 : f32 to vector<8x128xf32>
      %51 = arith.addf %50, %49 : vector<8x128xf32>
      %52 = arith.divf %50, %51 : vector<8x128xf32>
      %53 = arith.mulf %47, %52 : vector<8x128xf32>
      %54 = arith.truncf %53 : vector<8x128xf32> to vector<8x128xbf16>
      %c0_23 = arith.constant 0 : index
      %c0_24 = arith.constant 0 : index
      %55 = vector.load %arg8[%c0_23, %c0_24] : memref<128x128xbf16, #tpu.memory_space<vmem>>, vector<128x128xbf16>
      %cst_25 = arith.constant dense<0.000000e+00> : vector<8x128xf32>
      %56 = tpu.matmul %54, %55, %cst_25 {dimension_numbers = #tpu.dot_dimension_numbers<[1], [0], [0], [1], [0, 0, 1, 1], [], []>} : vector<8x128xbf16>, vector<128x128xbf16>, vector<8x128xf32> -> vector<8x128xf32>
      %c0_26 = arith.constant 0 : index
      %c0_27 = arith.constant 0 : index
      %57 = vector.load %arg9[%c0_26, %c0_27] : memref<8x128xf32, #tpu.memory_space<vmem>>, vector<8x128xf32>
      tpu.vector_store %arg9[%c0_26, %c0_27], %56 {strides = array<i32>} : memref<8x128xf32, #tpu.memory_space<vmem>>, vector<8x128xf32>,
    } else {
    }
    return
  }
  func.func @transform_0(%arg0: i32, %arg1: memref<2xi32, #tpu.memory_space<smem>>, %arg2: memref<2xi32, #tpu.memory_space<smem>>, %arg3: memref<2xi32, #tpu.memory_space<smem>>) -> (i32, i32) {
    %0 = arith.index_cast %arg0 : i32 to index
    %1 = memref.load %arg2[%0] : memref<2xi32, #tpu.memory_space<smem>>
    %c0_i32 = arith.constant 0 : i32
    %c0_i32_0 = arith.constant 0 : i32
    return %c0_i32, %1 : i32, i32
  }
  func.func @transform_1(%arg0: i32, %arg1: memref<2xi32, #tpu.memory_space<smem>>, %arg2: memref<2xi32, #tpu.memory_space<smem>>, %arg3: memref<2xi32, #tpu.memory_space<smem>>) -> (i32, i32) {
    %0 = arith.index_cast %arg0 : i32 to index
    %1 = memref.load %arg2[%0] : memref<2xi32, #tpu.memory_space<smem>>
    %c0_i32 = arith.constant 0 : i32
    %c0_i32_0 = arith.constant 0 : i32
    return %1, %c0_i32 : i32, i32
  }
  func.func @transform_2(%arg0: i32, %arg1: memref<2xi32, #tpu.memory_space<smem>>, %arg2: memref<2xi32, #tpu.memory_space<smem>>, %arg3: memref<2xi32, #tpu.memory_space<smem>>) -> (i32, i32, i32) {
    %c0_i32 = arith.constant 0 : i32
    %c0_i32_0 = arith.constant 0 : i32
    %c0_i32_1 = arith.constant 0 : i32
    %c0_i32_2 = arith.constant 0 : i32
    return %c0_i32, %c0_i32_0, %c0_i32_1 : i32, i32, i32
  }
  func.func @transform_3(%arg0: i32, %arg1: memref<2xi32, #tpu.memory_space<smem>>, %arg2: memref<2xi32, #tpu.memory_space<smem>>, %arg3: memref<2xi32, #tpu.memory_space<smem>>) -> (i32, i32, i32) {
    %c0_i32 = arith.constant 0 : i32
    %c0_i32_0 = arith.constant 0 : i32
    %c0_i32_1 = arith.constant 0 : i32
    %c0_i32_2 = arith.constant 0 : i32
    return %c0_i32, %c0_i32_0, %c0_i32_1 : i32, i32, i32
  }
  func.func @transform_4(%arg0: i32, %arg1: memref<2xi32, #tpu.memory_space<smem>>, %arg2: memref<2xi32, #tpu.memory_space<smem>>, %arg3: memref<2xi32, #tpu.memory_space<smem>>) -> (i32, i32) {
    %c0_i32 = arith.constant 0 : i32
    %c0_i32_0 = arith.constant 0 : i32
    %c0_i32_1 = arith.constant 0 : i32
    return %c0_i32, %c0_i32_0 : i32, i32
  }
  func.func @transform_5(%arg0: i32, %arg1: memref<2xi32, #tpu.memory_space<smem>>, %arg2: memref<2xi32, #tpu.memory_space<smem>>, %arg3: memref<2xi32, #tpu.memory_space<smem>>) -> (i32, i32) {
    %0 = arith.index_cast %arg0 : i32 to index
    %1 = memref.load %arg1[%0] : memref<2xi32, #tpu.memory_space<smem>>
    %c0_i32 = arith.constant 0 : i32
    %c0_i32_0 = arith.constant 0 : i32
    return %1, %c0_i32 : i32, i32
  }
}

</mosaic_0001>

<bundles_post_ra>
// kernel: custom-call
= control target key start
LH: loop header
LB: loop body
LE: loop exit
PB: predicated region body
PF: predicated region fallthrough
CT: control target
= control target key end

     0   :  { %s6_s0 = inlined_call_operand.vmem [shape: u32[2], index: 0, kind: output, shape index: {}]  }

// kernel: output_layer_forward.2
= control target key start
LH: loop header
LB: loop body
LE: loop exit
PB: predicated region body
PF: predicated region fallthrough
CT: control target
= control target key end

     0   :  { %s664_s2 = inlined_call_operand.vmem [shape: bf16[128,128], index: 2, kind: input, shape index: {}]   ;;  %s665_s0 = inlined_call_operand.vmem [shape: bf16[128,128], index: 0, kind: input, shape index: {}]   ;;  %s666_s1 = inlined_call_operand.vmem [shape: bf16[128,128], index: 1, kind: input, shape index: {}]   ;;  %s667_s3 = inlined_call_operand.vmem [shape: bf16[128,128], index: 3, kind: output, shape index: {}]  }
   0x1   :  { %v500_v0 = vld [vmem:[%s664_s2] sm:$0xff]   ;;  %v501_v1 = vld [vmem:[%s664_s2 + $0x8] sm:$0xff]   ;;  %v502_v2 = vld [vmem:[%s664_s2 + $0x10] sm:$0xff]  }
   0x2   :  { %452 = vmatprep.subr.bf16.mxu0 %v500_v0  ;;  %484 = vmatprep.subr.bf16.mxu1 %v500_v0  ;;  %v503_v3 = vld [vmem:[%s664_s2 + $0x18] sm:$0xff]   ;;  %v508_v4 = vld [vmem:[%s665_s0] sm:$0xff]   ;;  %v505_v7 = vld [vmem:[%s664_s2 + $0x28] sm:$0xff]  }
   0x3   :  { %453 = vmatpush3.bf16.msra.mxu0 %v500_v0  ;;  %492 = vmatpush3.bf16.msra.mxu1 %v500_v0  ;;  %v509_v5 = vld [vmem:[%s665_s0 + $0x20] sm:$0xff]   ;;  %v506_v8 = vld [vmem:[%s664_s2 + $0x30] sm:$0xff]   ;;  %v507_v9 = vld [vmem:[%s664_s2 + $0x38] sm:$0xff]  }
   0x4   :  { %454 = vmatprep.subr.bf16.mxu0 %v501_v1  ;;  %485 = vmatprep.subr.bf16.mxu1 %v501_v1  ;;  %v504_v6 = vld [vmem:[%s664_s2 + $0x20] sm:$0xff]   ;;  %v510_v10 = vld [vmem:[%s665_s0 + $0x8] sm:$0xff]   ;;  %v512_v12 = vld [vmem:[%s665_s0 + $0x10] sm:$0xff]  }
   0x5   :  { %468 = vmatprep.mubr.bf16.mxu0 %v508_v4  ;;  %476 = vmatprep.mubr.bf16.mxu1 %v509_v5  ;;  %v511_v11 = vld [vmem:[%s665_s0 + $0x28] sm:$0xff]   ;;  %v513_v13 = vld [vmem:[%s665_s0 + $0x30] sm:$0xff]   ;;  %v514_v14 = vld [vmem:[%s665_s0 + $0x18] sm:$0xff]  }
   0x6   :  { %v515_v15 = vld [vmem:[%s665_s0 + $0x38] sm:$0xff]   ;;  %v516_v20 = vld [vmem:[%s666_s1 + $0x8] sm:$0xff]   ;;  %v518_v24 = vld [vmem:[%s666_s1] sm:$0xff]  }
   0x7   :  { %455 = vmatpush3.bf16.msra.mxu0 %v501_v1  ;;  %493 = vmatpush3.bf16.msra.mxu1 %v501_v1  ;;  %v517_v21 = vld [vmem:[%s666_s1 + $0x28] sm:$0xff]   ;;  %v519_v25 = vld [vmem:[%s666_s1 + $0x20] sm:$0xff]   ;;  %v520_v48 = vld [vmem:[%s666_s1 + $0x18] sm:$0xff]  }
   0x8   :  { %456 = vmatprep.subr.bf16.mxu0 %v502_v2  ;;  %486 = vmatprep.subr.bf16.mxu1 %v502_v2  ;;  %v521_v49 = vld [vmem:[%s666_s1 + $0x38] sm:$0xff]   ;;  %v522_v52 = vld [vmem:[%s666_s1 + $0x10] sm:$0xff]  }
   0x9   :  { %v523_v53 = vld [vmem:[%s666_s1 + $0x30] sm:$0xff]  }
   0xb   :  { %457 = vmatpush3.bf16.msra.mxu0 %v502_v2  ;;  %494 = vmatpush3.bf16.msra.mxu1 %v502_v2 }
   0xc   :  { %458 = vmatprep.subr.bf16.mxu0 %v503_v3  ;;  %487 = vmatprep.subr.bf16.mxu1 %v503_v3 }
   0xf   :  { %459 = vmatpush3.bf16.msra.mxu0 %v503_v3  ;;  %495 = vmatpush3.bf16.msra.mxu1 %v503_v3 }
  0x10   :  { %460 = vmatprep.subr.bf16.mxu0 %v504_v6  ;;  %488 = vmatprep.subr.bf16.mxu1 %v504_v6 }
  0x13   :  { %461 = vmatpush3.bf16.msra.mxu0 %v504_v6  ;;  %496 = vmatpush3.bf16.msra.mxu1 %v504_v6 }
  0x14   :  { %462 = vmatprep.subr.bf16.mxu0 %v505_v7  ;;  %489 = vmatprep.subr.bf16.mxu1 %v505_v7 }
  0x17   :  { %463 = vmatpush3.bf16.msra.mxu0 %v505_v7  ;;  %497 = vmatpush3.bf16.msra.mxu1 %v505_v7 }
  0x18   :  { %464 = vmatprep.subr.bf16.mxu0 %v506_v8  ;;  %490 = vmatprep.subr.bf16.mxu1 %v506_v8 }
  0x1b   :  { %465 = vmatpush3.bf16.msra.mxu0 %v506_v8  ;;  %498 = vmatpush3.bf16.msra.mxu1 %v506_v8 }
  0x1c   :  { %466 = vmatprep.subr.bf16.mxu0 %v507_v9  ;;  %491 = vmatprep.subr.bf16.mxu1 %v507_v9 }
  0x1f   :  { %467 = vmatpush3.bf16.msra.mxu0 %v507_v9  ;;  %499 = vmatpush3.bf16.msra.mxu1 %v507_v9 }
  0x22   :  { %469 = vmatmul.mubr.bf16.vlgmr.msra.gmra.mrb[0].mxu0 %v510_v10  ;;  %477 = vmatmul.mubr.bf16.vlgmr.msra.gmra.mrb[0].mxu1 %v511_v11 }
  0x23   :  { %472 = vmatprep.mubr.bf16.mxu0 %v512_v12  ;;  %480 = vmatprep.mubr.bf16.mxu1 %v513_v13 }
  0x2a   :  { %473 = vmatmul.mubr.bf16.gmra.mrb[4].mxu0 %v514_v14  ;;  %481 = vmatmul.mubr.bf16.gmra.mrb[4].mxu1 %v515_v15 }
  0xf5   :  { %v470_v16 = vpop.f32.mrb[0].mxu0  ;;  %v478_v17 = vpop.f32.mrb[0].mxu1 }
  0xf6   :  { %v177_v18 = vpop.f32.mrb[1].mxu0  ;;  %v209_v19 = vpop.f32.mrb[1].mxu1 }
  0xf7   :  { %v471_v22 = vpop.f32.mrb[2].mxu0  ;;  %v479_v23 = vpop.f32.mrb[2].mxu1 }
  0xf8   :  { %v241_v26 = vpack.c.bf16 %v471_v22, %v470_v16  ;;  %v245_v27 = vpack.c.bf16 %v479_v23, %v478_v17  ;;  %v180_v28 = vpop.f32.mrb[3].mxu0  ;;  %v212_v29 = vpop.f32.mrb[3].mxu1 }
  0xf9   :  { %v240_v30 = vpack.c.bf16 %v180_v28, %v177_v18  ;;  %v244_v31 = vpack.c.bf16 %v212_v29, %v209_v19 }
  0xfa   :  { %v313_v32 = vmul.bf16 %v516_v20, %v241_v26  ;;  %v317_v33 = vmul.bf16 %v517_v21, %v245_v27 }
  0xfb   :  { %v312_v34 = vmul.bf16 %v518_v24, %v240_v30  ;;  %v316_v35 = vmul.bf16 %v519_v25, %v244_v31 }
  0xfc   :  { %v422_v36 = vcombine.low %v313_v32, %v313_v32  ;;  %v423_v37 = vcombine.high %v313_v32, %v313_v32  ;;  %v430_v38 = vcombine.low %v317_v33, %v317_v33  ;;  %v431_v39 = vcombine.high %v317_v33, %v317_v33 }
  0xfd   :  { %v420_v40 = vcombine.low %v312_v34, %v312_v34  ;;  %v421_v41 = vcombine.high %v312_v34, %v312_v34  ;;  %v428_v42 = vcombine.low %v316_v35, %v316_v35  ;;  %v429_v43 = vcombine.high %v316_v35, %v316_v35  ;;  %v474_v44 = vpop.f32.mrb[4].mxu0  ;;  %v482_v45 = vpop.f32.mrb[4].mxu1 }
  0xfe   :  { %378 = vst [vmem:[%s667_s3 + $0x8] sm:$0xf] %v422_v36  ;;  %379 = vst [vmem:[%s667_s3 + $0xc] sm:$0xf] %v423_v37  ;;  %v193_v46 = vpop.f32.mrb[5].mxu0  ;;  %v225_v47 = vpop.f32.mrb[5].mxu1 }
  0xff   :  { %386 = vst [vmem:[%s667_s3 + $0x28] sm:$0xf] %v430_v38  ;;  %387 = vst [vmem:[%s667_s3 + $0x2c] sm:$0xf] %v431_v39  ;;  %v475_v50 = vpop.f32.mrb[6].mxu0  ;;  %v483_v51 = vpop.f32.mrb[6].mxu1 }
 0x100   :  { %376 = vst [vmem:[%s667_s3] sm:$0xf] %v420_v40  ;;  %377 = vst [vmem:[%s667_s3 + $0x4] sm:$0xf] %v421_v41  ;;  %v243_v54 = vpack.c.bf16 %v475_v50, %v474_v44  ;;  %v247_v55 = vpack.c.bf16 %v483_v51, %v482_v45  ;;  %v196_v56 = vpop.f32.mrb[7].mxu0  ;;  %v228_v57 = vpop.f32.mrb[7].mxu1 }
 0x101   :  { %384 = vst [vmem:[%s667_s3 + $0x20] sm:$0xf] %v428_v42  ;;  %385 = vst [vmem:[%s667_s3 + $0x24] sm:$0xf] %v429_v43  ;;  %v242_v58 = vpack.c.bf16 %v196_v56, %v193_v46  ;;  %v246_v59 = vpack.c.bf16 %v228_v57, %v225_v47 }
 0x102   :  { %v315_v60 = vmul.bf16 %v520_v48, %v243_v54  ;;  %v319_v61 = vmul.bf16 %v521_v49, %v247_v55 }
 0x103   :  { %v314_v62 = vmul.bf16 %v522_v52, %v242_v58  ;;  %v318_v63 = vmul.bf16 %v523_v53, %v246_v59 }
 0x104   :  { %v426_v0 = vcombine.low %v315_v60, %v315_v60  ;;  %v427_v1 = vcombine.high %v315_v60, %v315_v60  ;;  %v434_v2 = vcombine.low %v319_v61, %v319_v61  ;;  %v435_v3 = vcombine.high %v319_v61, %v319_v61 }
 0x105   :  { %v424_v4 = vcombine.low %v314_v62, %v314_v62  ;;  %v425_v5 = vcombine.high %v314_v62, %v314_v62  ;;  %v432_v6 = vcombine.low %v318_v63, %v318_v63  ;;  %v433_v7 = vcombine.high %v318_v63, %v318_v63 }
 0x106   :  { %382 = vst [vmem:[%s667_s3 + $0x18] sm:$0xf] %v426_v0  ;;  %383 = vst [vmem:[%s667_s3 + $0x1c] sm:$0xf] %v427_v1 }
 0x107   :  { %390 = vst [vmem:[%s667_s3 + $0x38] sm:$0xf] %v434_v2  ;;  %391 = vst [vmem:[%s667_s3 + $0x3c] sm:$0xf] %v435_v3 }
 0x108   :  { %380 = vst [vmem:[%s667_s3 + $0x10] sm:$0xf] %v424_v4  ;;  %381 = vst [vmem:[%s667_s3 + $0x14] sm:$0xf] %v425_v5 }
 0x109   :  { %388 = vst [vmem:[%s667_s3 + $0x30] sm:$0xf] %v432_v6  ;;  %389 = vst [vmem:[%s667_s3 + $0x34] sm:$0xf] %v433_v7 }

// kernel: output_layer_forward.3
= control target key start
LH: loop header
LB: loop body
LE: loop exit
PB: predicated region body
PF: predicated region fallthrough
CT: control target
= control target key end

     0   :  { %s1358_s0 = inlined_call_operand.vmem [shape: s32[2], index: 0, kind: input, shape index: {}]   ;;  %s1359_s3 = inlined_call_operand.vmem [shape: s32[1,128], index: 3, kind: input, shape index: {}]   ;;  %s1360_s4 = inlined_call_operand.vmem [shape: bf16[128,128], index: 4, kind: input, shape index: {}]   ;;  %s1361_s5 = inlined_call_operand.vmem [shape: bf16[2,128,128], index: 5, kind: input, shape index: {}]   ;;  %s1362_s6 = inlined_call_operand.vmem [shape: f32[2,1,128], index: 6, kind: input, shape index: {}]   ;;  %s1363_s7 = inlined_call_operand.vmem [shape: bf16[128,128], index: 7, kind: input, shape index: {}]   ;;  %s1364_s8 = inlined_call_operand.vmem [shape: f32[8,128], index: 8, kind: output, shape index: {}]   ;;  %s1365_s1 = inlined_call_operand.vmem [shape: s32[2], index: 1, kind: input, shape index: {}]   ;;  %s1366_s2 = inlined_call_operand.vmem [shape: s32[2], index: 2, kind: input, shape index: {}]  }
   0x1   :  { %s13_s29 = sshll.u32 %s1358_s0, 4  ;;  %s17_s10 = sshll.u32 %s1365_s1, 4  ;;  %s14_s29 = int_to_ptr.vmem [resolvable:$true] %s13_s29  ;;  %s18_s10 = int_to_ptr.vmem [resolvable:$true] %s17_s10 }
   0x2   :  { %s1078_s11 = scalar_lea.vmem %s14_s29, 16  ;;  %p1083_p1 = scmp.lt.s32.totalorder %s14_s29, %s14_s29 }
   0x3   :  { %p1079_p0 = scmp.ne.s32.totalorder %s14_s29, %s1078_s11  ;;  %p1084_p2 = scmp.lt.s32.totalorder %s1078_s11, %s1078_s11 }
   0x5   :  { %p1085_p3 = por %p1084_p2, %p1083_p1 }
   0x7   :  { %p1086_p4 = pnand %p1085_p3, %p1079_p0 }
   0x9   :  { %1089 = shalt.err (!%p1086_p4)  }
   0xa   :  { %s1124_s12 = smov [#allocation4]   ;;  %s1090_s13 = scalar_lea.vmem %s18_s10, 16 }
   0xb   :  { %16 = dma.vmem_to_smem %s14_s29, 16, %s1124_s12, [#allocation3] }
   0xc   :  { %p1091_p5 = scmp.ne.s32.totalorder %s18_s10, %s1090_s13  ;;  %p1095_p6 = scmp.lt.s32.totalorder %s18_s10, %s18_s10 }
   0xd   :  { %p1096_p7 = scmp.lt.s32.totalorder %s1090_s13, %s1090_s13 }
   0xf   :  { %p1097_p8 = por %p1096_p7, %p1095_p6 }
  0x11   :  { %p1098_p9 = pnand %p1097_p8, %p1091_p5 }
  0x13   :  { %1101 = shalt.err (!%p1098_p9)  }
  0x14   :  { %s1125_s0 = smov [#allocation5]   ;;  %s21_s15 = sshll.u32 %s1366_s2, 4  ;;  %s22_s15 = int_to_ptr.vmem [resolvable:$true] %s21_s15 }
  0x15   :  { %20 = dma.vmem_to_smem %s18_s10, 16, %s1125_s0, [#allocation3] }
  0x16   :  { %s1102_s16 = scalar_lea.vmem %s22_s15, 16  ;;  %p1107_p11 = scmp.lt.s32.totalorder %s22_s15, %s22_s15 }
  0x17   :  { %p1103_p10 = scmp.ne.s32.totalorder %s22_s15, %s1102_s16  ;;  %p1108_p12 = scmp.lt.s32.totalorder %s1102_s16, %s1102_s16 }
  0x19   :  { %p1109_p13 = por %p1108_p12, %p1107_p11 }
  0x1b   :  { %p1110_p0 = pnand %p1109_p13, %p1103_p10 }
  0x1d   :  { %1113 = shalt.err (!%p1110_p0)  }
  0x1e   :  { %s1126_s17 = smov [#allocation6]  }
  0x1f   :  { %24 = dma.vmem_to_smem %s22_s15, 16, %s1126_s17, [#allocation3] }
  0x20   :  { %1118 = dma.done.wait [#allocation3], 48 }
  0x21   :  { %1119 = vsyncadd [#allocation3], 4294967248 }
  0x22   :  { %26 = sfence }
  0x23   :  { %s1187_s18 = smov 0  }
  0x24 LB: > { %s1193_s2 = sadd.s32 4294967295, %s1122_s18   ;;  %p840_p1 = scmp.ge.s32.totalorder %s1122_s18, 1  ;;  %s1122_s18 = sphi %s1187_s18, %s32_s18  }
  0x25   : > { %p223_p2 = scmp.lt.s32.totalorder %s1122_s18, 3 }
  0x27   : > { %p224_p3 = pnand %p840_p1, %p223_p2 }
  0x28   : > { %s256_s19 = sld [smem:[#allocation5 + %s1193_s2]] (!%p224_p3)  ;;  %s844_s22 = sadd.s32 (!%p224_p3), 4294967295, %s1193_s2 }
  0x29   : > { %227 = sbr.rel (%p224_p3) target bundleno = 1059 (0x423), region = 40  ;;  %s261_s20 = sld [smem:[#allocation5 + %s1193_s2]] (!%p224_p3) }
  0x2a   : > { %s269_s21 = sld [smem:[#allocation4 + %s1193_s2]] (!%p224_p3)  ;;  %p279_p4 = scmp.gt.s32.totalorder (!%p224_p3), %s844_s22, 0 }
  0x2b   : > { %s1202_s23 = sld [smem:[#allocation4 + %s1193_s2]] (!%p224_p3)  ;;  %s285_s24 = sadd.s32 (!%p224_p3), 1, %s1193_s2 }
  0x2c   : > { %p286_p8 = scmp.lt.s32.totalorder (!%p224_p3), %s285_s24, 1  ;;  %p277_p9 = scmp.eq.s32.totalorder (!%p224_p3), %s1193_s2, 0 }
  0x2d   : > { %p284_p12 = scmp.eq.s32.totalorder (!%p224_p3), %s1193_s2, 1 }
  0x2e   : > { %p257_p5 = scmp.lt.s32.totalorder (!%p224_p3), %s256_s19, 0 }
  0x2f   : > { %s841_s25 = sshll.u32 (!%p224_p3), %s261_s20, 4 }
  0x30   : > { %s1369_s22 = smov (!%p279_p4, %s844_s22), 0  ;;  %p263_p6 = scmp.lt.s32.totalorder %s841_s25, 15 }
  0x31   : > { %p270_p7 = scmp.lt.s32.totalorder %s269_s21, 0  ;;  %s1371_s19 = smov (!%p257_p5, %s256_s19), 0 }
  0x32   : > { %s1373_s25 = smov (!%p263_p6, %s841_s25), 15  ;;  %s259_s28 = scalar_lea.vmem %s1359_s3, %s1371_s19 }
  0x33   : > { %s281_s29 = sld [smem:[#allocation4 + %s1369_s22]]  ;;  %s842_s30 = sshll.u32 %s1373_s25, 2 }
  0x34   : > { %s1214_s11 = scalar_lea.vmem %s1360_s4, %s842_s30  ;;  %s1375_s21 = smov (!%p270_p7, %s269_s21), 0 }
  0x35   : > { %s1377_s24 = smov (!%p286_p8, %s285_s24), 1  ;;  %s843_s12 = sshll.u32 %s1375_s21, 3 }
  0x36   : > { %s1220_s1 = scalar_lea.vmem %s1364_s8, %s843_s12  ;;  %s288_s14 = sld [smem:[#allocation4 + %s1377_s24]] }
  0x39   : > { %p282_p10 = scmp.ne.s32.totalorder %s1202_s23, %s281_s29 }
  0x3b   : > { %p283_p11 = por %p282_p10, %p277_p9 }
  0x3c   : > { %p289_p13 = scmp.ne.s32.totalorder %s1202_s23, %s288_s14  ;;  %v1127_v0 = vmov (%p283_p11), 0.0  }
  0x3d   : > { %293 = sbr.rel (!%p283_p11) target bundleno = 68 (0x44), region = 44  ;;  %294 = vst [vmem:[#allocation2] sm:$0xff] (%p283_p11), %v1127_v0 }
  0x3e   : > { %p1225_p0 = por %p289_p13, %p284_p12 }
  0x44 PF: > { %s295_s16 = sld [smem:[#allocation6 + %s1193_s2]] }
  0x4a   : > { %p845_p1 = scmp.eq.s32.totalorder %s295_s16, 0 }
  0x4b   : > { %v1038_v1 = vld [vmem:[%s1214_s11] sm:$0xff] (!%p845_p1)   ;;  %v1128_v2 = vmov (!%p845_p1), 0.0   ;;  %v1039_v3 = vld [vmem:[%s1214_s11 + $0x8] sm:$0xff] (!%p845_p1)   ;;  %vm1129_vm0 = vmmov (!%p845_p1), 0   ;;  %v1040_v4 = vld [vmem:[%s1214_s11 + $0x10] sm:$0xff] (!%p845_p1)   ;;  %v304_v6 = vlaneseq (!%p845_p1)  ;;  %s846_s17 = sshll.u32 (!%p845_p1), %s1202_s23, 3 }
  0x4c   : > { %299 = sbr.rel (%p845_p1) target bundleno = 323 (0x143), region = 48  ;;  %941 = vmatprep.subr.bf16.mxu0 (!%p845_p1), %v1128_v2  ;;  %957 = vmatprep.mubr.msk.bf16.mxu0 (!%p845_p1), %vm1129_vm0, %v1128_v2  ;;  %v1041_v5 = vld [vmem:[%s1214_s11 + $0x18] sm:$0xff] (!%p845_p1)   ;;  %v1042_v7 = vld [vmem:[%s1214_s11 + $0x20] sm:$0xff] (!%p845_p1)   ;;  %v302_v10 = vstv (!%p845_p1), %s846_s17  ;;  %v1043_v11 = vld [vmem:[%s1214_s11 + $0x28] sm:$0xff] (!%p845_p1)   ;;  %v1130_v17 = vmov (!%p845_p1), 1.0|1.0  }
  0x4d   : > { %942 = vmatpush3.bf16.msra.mxu0 (!%p845_p1), %v1038_v1  ;;  %v305_v8 = vshrl.u32 (!%p845_p1), %v304_v6, 7  ;;  %v300_v9 = vld [vmem:[%s259_s28] sm:$0x1] (!%p845_p1)  ;;  %v1044_v14 = vld [vmem:[%s1214_s11 + $0x30] sm:$0xff] (!%p845_p1)   ;;  %v1045_v16 = vld [vmem:[%s1214_s11 + $0x38] sm:$0xff] (!%p845_p1)  }
  0x4e   : > { %943 = vmatprep.subr.bf16.mxu0 (!%p845_p1), %v1128_v2  ;;  %v303_v12 = vsub.s32 (!%p845_p1), %v300_v9, %v302_v10  ;;  %v314_v18 = vld [vmem:[#allocation2] sm:$0xff] (!%p845_p1) }
  0x4f   : > { %v308_v13 = vsub.s32 (!%p845_p1), 0, %v305_v8 }
  0x51   : > { %944 = vmatpush3.bf16.msra.mxu0 (!%p845_p1), %v1039_v3  ;;  %v309_v15 = vrot.slane (!%p845_p1), %v303_v12, %v308_v13 }
  0x52   : > { %945 = vmatprep.subr.bf16.mxu0 (!%p845_p1), %v1128_v2 }
  0x53   : > { %vm310_vm1 = vcmp.eq.s32.totalorder %v309_v15, %v305_v8 }
  0x54   : > { %vm856_vm2 = vmpackc.low %vm310_vm1, %vm310_vm1 }
  0x55   : > { %946 = vmatpush3.bf16.msra.mxu0 %v1040_v4 }
  0x56   : > { %947 = vmatprep.subr.bf16.mxu0 %v1128_v2 }
  0x59   : > { %948 = vmatpush3.bf16.msra.mxu0 %v1041_v5 }
  0x5a   : > { %949 = vmatprep.subr.bf16.mxu0 %v1128_v2 }
  0x5d   : > { %950 = vmatpush3.bf16.msra.mxu0 %v1042_v7 }
  0x5e   : > { %951 = vmatprep.subr.bf16.mxu0 %v1128_v2 }
  0x61   : > { %952 = vmatpush3.bf16.msra.mxu0 %v1043_v11 }
  0x62   : > { %953 = vmatprep.subr.bf16.mxu0 %v1128_v2 }
  0x65   : > { %954 = vmatpush3.bf16.msra.mxu0 %v1044_v14 }
  0x66   : > { %955 = vmatprep.subr.bf16.mxu0 %v1128_v2 }
  0x69   : > { %956 = vmatpush3.bf16.msra.mxu0 %v1045_v16 }
  0x6c   : > { %958 = vmatmul.mubr.msk.bf16.vlgmr.msra.gmra.mrb[0].mxu0 %vm856_vm2, %v1130_v17 }
 0x13f   : > { %v413_v19 = vpop.f32.mrb[0].mxu0 }
 0x140   : > { %v419_v20 = vadd.f32 %v413_v19, %v314_v18  ;;  %v959_v21 = vpop.f32.mrb[1].mxu0 }
 0x141   : > { %v416_v22 = vpop.f32.mrb[2].mxu0 }
 0x142   : > { %420 = vst [vmem:[#allocation2] sm:$0xff] %v419_v20  ;;  %v960_v23 = vpop.f32.mrb[3].mxu0 }
 0x143 PF: > { %423 = sbr.rel (!%p1225_p0) target bundleno = 1059 (0x423), region = 52  ;;  %v1046_v24 = vld [vmem:[%s1361_s5] sm:$0xff] (%p1225_p0)   ;;  %v1131_v25 = vmov (%p1225_p0), 0.0   ;;  %v1047_v26 = vld [vmem:[%s1361_s5 + $0x8] sm:$0xff] (%p1225_p0)   ;;  %vm1132_vm3 = vmmov (%p1225_p0), 0   ;;  %v1048_v27 = vld [vmem:[%s1361_s5 + $0x10] sm:$0xff] (%p1225_p0)  }
 0x144   : > { %961 = vmatprep.subr.bf16.mxu0 (%p1225_p0), %v1131_v25  ;;  %981 = vmatprep.subr.bf16.mxu1 (%p1225_p0), %v1131_v25  ;;  %v1049_v28 = vld [vmem:[%s1361_s5 + $0x18] sm:$0xff] (%p1225_p0)   ;;  %v1050_v29 = vld [vmem:[%s1361_s5 + $0x20] sm:$0xff] (%p1225_p0)   ;;  %v1051_v30 = vld [vmem:[%s1361_s5 + $0x28] sm:$0xff] (%p1225_p0)  }
 0x145   : > { %962 = vmatpush3.bf16.msra.mxu0 (%p1225_p0), %v1046_v24  ;;  %977 = vmatprep.mubr.msk.bf16.mxu0 (%p1225_p0), %vm1132_vm3, %v1131_v25  ;;  %v1052_v31 = vld [vmem:[%s1361_s5 + $0x30] sm:$0xff] (%p1225_p0)   ;;  %v1053_v32 = vld [vmem:[%s1361_s5 + $0x38] sm:$0xff] (%p1225_p0)   ;;  %v1054_v35 = vld [vmem:[%s1361_s5 + $0x40] sm:$0xff] (%p1225_p0)  }
 0x146   : > { %963 = vmatprep.subr.bf16.mxu0 (%p1225_p0), %v1131_v25  ;;  %997 = vmatprep.mubr.msk.bf16.mxu1 (%p1225_p0), %vm1132_vm3, %v1131_v25  ;;  %v1055_v36 = vld [vmem:[%s1361_s5 + $0x48] sm:$0xff] (%p1225_p0)   ;;  %v1056_v37 = vld [vmem:[%s1361_s5 + $0x50] sm:$0xff] (%p1225_p0)   ;;  %v1057_v38 = vld [vmem:[%s1361_s5 + $0x58] sm:$0xff] (%p1225_p0)  }
 0x147   : > { %982 = vmatpush3.bf16.msra.mxu1 (%p1225_p0), %v1054_v35  ;;  %v1058_v39 = vld [vmem:[%s1361_s5 + $0x60] sm:$0xff] (%p1225_p0)   ;;  %v1059_v40 = vld [vmem:[%s1361_s5 + $0x68] sm:$0xff] (%p1225_p0)   ;;  %v1060_v41 = vld [vmem:[%s1361_s5 + $0x70] sm:$0xff] (%p1225_p0)  }
 0x148   : > { %983 = vmatprep.subr.bf16.mxu1 (%p1225_p0), %v1131_v25  ;;  %v1061_v42 = vld [vmem:[%s1361_s5 + $0x78] sm:$0xff] (%p1225_p0)   ;;  %v858_v43 = vld [vmem:[%s1362_s6] ss:$0 sm:$0xff] (%p1225_p0)  ;;  %v1063_v56 = vld [vmem:[%s1363_s7 + $0x8] sm:$0xff] (%p1225_p0)  }
 0x149   : > { %964 = vmatpush3.bf16.msra.mxu0 (%p1225_p0), %v1047_v26  ;;  %v424_v33 = vld [vmem:[#allocation2] sm:$0xff] (%p1225_p0)  ;;  %v1064_v57 = vld [vmem:[%s1363_s7 + $0x10] sm:$0xff] (%p1225_p0)   ;;  %v1065_v58 = vld [vmem:[%s1363_s7 + $0x18] sm:$0xff] (%p1225_p0)  }
 0x14a   : > { %965 = vmatprep.subr.bf16.mxu0 %v1131_v25  ;;  %v425_v34 = vpack.c.bf16 %v424_v33, %v424_v33  ;;  %v1062_v55 = vld [vmem:[%s1363_s7] sm:$0xff]   ;;  %v1067_v60 = vld [vmem:[%s1363_s7 + $0x28] sm:$0xff]   ;;  %v1068_v61 = vld [vmem:[%s1363_s7 + $0x30] sm:$0xff]  }
 0x14b   : > { %984 = vmatpush3.bf16.msra.mxu1 %v1055_v36  ;;  %v1066_v59 = vld [vmem:[%s1363_s7 + $0x20] sm:$0xff]   ;;  %v1069_v62 = vld [vmem:[%s1363_s7 + $0x38] sm:$0xff]  }
 0x14c   : > { %985 = vmatprep.subr.bf16.mxu1 %v1131_v25  ;;  %v885_v63 = vld [vmem:[%s1362_s6 + $0x1] ss:$0 sm:$0xff] }
 0x14d   : > { %966 = vmatpush3.bf16.msra.mxu0 %v1048_v27 }
 0x14e   : > { %967 = vmatprep.subr.bf16.mxu0 %v1131_v25 }
 0x14f   : > { %986 = vmatpush3.bf16.msra.mxu1 %v1056_v37 }
 0x150   : > { %987 = vmatprep.subr.bf16.mxu1 %v1131_v25 }
 0x151   : > { %968 = vmatpush3.bf16.msra.mxu0 %v1049_v28 }
 0x152   : > { %969 = vmatprep.subr.bf16.mxu0 %v1131_v25 }
 0x153   : > { %988 = vmatpush3.bf16.msra.mxu1 %v1057_v38 }
 0x154   : > { %989 = vmatprep.subr.bf16.mxu1 %v1131_v25 }
 0x155   : > { %970 = vmatpush3.bf16.msra.mxu0 %v1050_v29 }
 0x156   : > { %971 = vmatprep.subr.bf16.mxu0 %v1131_v25 }
 0x157   : > { %990 = vmatpush3.bf16.msra.mxu1 %v1058_v39 }
 0x158   : > { %991 = vmatprep.subr.bf16.mxu1 %v1131_v25 }
 0x159   : > { %972 = vmatpush3.bf16.msra.mxu0 %v1051_v30 }
 0x15a   : > { %973 = vmatprep.subr.bf16.mxu0 %v1131_v25 }
 0x15b   : > { %992 = vmatpush3.bf16.msra.mxu1 %v1059_v40 }
 0x15c   : > { %993 = vmatprep.subr.bf16.mxu1 %v1131_v25 }
 0x15d   : > { %974 = vmatpush3.bf16.msra.mxu0 %v1052_v31 }
 0x15e   : > { %975 = vmatprep.subr.bf16.mxu0 %v1131_v25 }
 0x15f   : > { %994 = vmatpush3.bf16.msra.mxu1 %v1060_v41 }
 0x160   : > { %995 = vmatprep.subr.bf16.mxu1 %v1131_v25 }
 0x161   : > { %976 = vmatpush3.bf16.msra.mxu0 %v1053_v32 }
 0x162   : > { %1001 = vmatprep.subr.bf16.mxu0 %v1131_v25 }
 0x163   : > { %996 = vmatpush3.bf16.msra.mxu1 %v1061_v42 }
 0x164   : > { %978 = vmatmul.mubr.bf16.vlgmr.msra.gmra.mrb[0].mxu0 %v425_v34 }
 0x165   : > { %1017 = vmatprep.mubr.msk.bf16.mxu0 %vm1132_vm3, %v1131_v25  ;;  %1002 = vmatpush3.bf16.msra.mxu0 %v1062_v55 }
 0x166   : > { %1003 = vmatprep.subr.bf16.mxu0 %v1131_v25 }
 0x169   : > { %1004 = vmatpush3.bf16.msra.mxu0 %v1063_v56 }
 0x16a   : > { %1005 = vmatprep.subr.bf16.mxu0 %v1131_v25 }
 0x16d   : > { %1006 = vmatpush3.bf16.msra.mxu0 %v1064_v57 }
 0x16e   : > { %1007 = vmatprep.subr.bf16.mxu0 %v1131_v25 }
 0x171   : > { %1008 = vmatpush3.bf16.msra.mxu0 %v1065_v58 }
 0x172   : > { %1009 = vmatprep.subr.bf16.mxu0 %v1131_v25 }
 0x175   : > { %1010 = vmatpush3.bf16.msra.mxu0 %v1066_v59 }
 0x176   : > { %1011 = vmatprep.subr.bf16.mxu0 %v1131_v25 }
 0x179   : > { %1012 = vmatpush3.bf16.msra.mxu0 %v1067_v60 }
 0x17a   : > { %1013 = vmatprep.subr.bf16.mxu0 %v1131_v25 }
 0x17d   : > { %1014 = vmatpush3.bf16.msra.mxu0 %v1068_v61 }
 0x17e   : > { %1015 = vmatprep.subr.bf16.mxu0 %v1131_v25 }
 0x181   : > { %1016 = vmatpush3.bf16.msra.mxu0 %v1069_v62 }
 0x237   : > { %v531_v44 = vpop.f32.mrb[0].mxu0 }
 0x238   : > { %v532_v45 = vadd.f32 %v858_v43, %v531_v44  ;;  %v979_v46 = vpop.f32.mrb[1].mxu0 }
 0x239   : > { %v534_v47 = vpop.f32.mrb[2].mxu0 }
 0x23a   : > { %v867_v48 = vmul.f32 -1.442695, %v532_v45  ;;  %v980_v49 = vpop.f32.mrb[3].mxu0 }
 0x23c   : > { %1070 = vpow2.f32 %v867_v48 }
 0x246   : > { %v1071_v50 = vpop.eup %1070 }
 0x247   : > { %v540_v51 = vadd.f32 1.0, %v1071_v50 }
 0x249   : > { %1072 = vrcp.f32 %v540_v51 }
 0x253   : > { %v1073_v52 = vpop.eup %1072 }
 0x254   : > { %v543_v53 = vmul.f32 %v1073_v52, %v532_v45 }
 0x256   : > { %v544_v54 = vpack.c.bf16 %v543_v53, %v543_v53 }
 0x258   : > { %998 = vmatmul.mubr.bf16.vlgmr.msra.gmra.mrb[0].mxu1 %v544_v54 }
 0x32b   : > { %v652_v0 = vpop.f32.mrb[0].mxu1 }
 0x32c   : > { %v653_v1 = vadd.f32 %v885_v63, %v652_v0  ;;  %v999_v2 = vpop.f32.mrb[1].mxu1 }
 0x32d   : > { %v655_v3 = vpop.f32.mrb[2].mxu1 }
 0x32e   : > { %v894_v4 = vmul.f32 -1.442695, %v653_v1  ;;  %v1000_v5 = vpop.f32.mrb[3].mxu1 }
 0x330   : > { %1074 = vpow2.f32 %v894_v4 }
 0x33a   : > { %v1075_v6 = vpop.eup %1074 }
 0x33b   : > { %v661_v7 = vadd.f32 1.0, %v1075_v6 }
 0x33d   : > { %1076 = vrcp.f32 %v661_v7 }
 0x347   : > { %v1077_v8 = vpop.eup %1076 }
 0x348   : > { %v664_v9 = vmul.f32 %v1077_v8, %v653_v1 }
 0x34a   : > { %v665_v10 = vpack.c.bf16 %v664_v9, %v664_v9 }
 0x34c   : > { %1018 = vmatmul.mubr.bf16.vlgmr.msra.gmra.mrb[4].mxu0 %v665_v10 }
 0x41f   : > { %v764_v11 = vpop.f32.mrb[4].mxu0 }
 0x420   : > { %770 = vst [vmem:[%s1220_s1] sm:$0xff] %v764_v11  ;;  %v1019_v12 = vpop.f32.mrb[5].mxu0 }
 0x421   : > { %v767_v13 = vpop.f32.mrb[6].mxu0 }
 0x422   : > { %v1020_v14 = vpop.f32.mrb[7].mxu0 }
 0x423 PF: > { %s32_s18 = sadd.s32 1, %s1122_s18  }
 0x424   : > { %p29_p2 = scmp.ge.s32.totalorder %s32_s18, 4  }
 0x426   :  { %31 = sbr.rel (!%p29_p2) target bundleno = 36 (0x24), region = 87 }

</bundles_post_ra>
